<compile_context>
chip_gen: v5e
topology: v5e:2x2
jax: 0.10.0
libtpu: 0.0.40
codegen_flags: <defaults>
</compile_context>

<pallas_src>
import jax
import jax.numpy as jnp
from jax.experimental import pallas as pl
from jax.experimental.pallas import tpu as pltpu


def _round_up(v, m):
    return ((v + m - 1) // m) * m


def _make_kernel(n_mlps, k, g):
    """Kernel refs: (nbr, ctr, *stage_params, out, acc).

    Per-stage params (3 each): stage 0 -> (w_ctr, w_nbr, b); stage i >= 1 ->
    (w_h, w_x, b).  All weights are (g, c_in_piece), channels along sublanes.

    acc (VMEM scratch, (k, n*g, tile_p) f32) holds h_i in rows
    [(n-1-i)*g, (n-i)*g) so the input of stage i is the contiguous row slice
    [(n-i)*g, n*g).  The centre feature is never replicated over k: its
    contribution is identical for every neighbour and is computed once per
    stage (w_x @ ctr + b).
    """

    def kernel(*refs):
        nbr_ref, ctr_ref = refs[0], refs[1]
        out_ref, acc_ref = refs[-2], refs[-1]
        params = refs[2:-2]

        ctr = ctr_ref[...].astype(jnp.float32)                      # (C, tp)

        # ---- stage 0: h0_j = relu(W_nbr @ nbr_j + (W_ctr @ ctr + b)) ------
        w_ctr = params[0][...]
        w_nbr = params[1][...]
        b0 = params[2][...]
        shared = jnp.dot(w_ctr, ctr, preferred_element_type=jnp.float32) + b0
        row = (n_mlps - 1) * g
        for j in range(k):
            nbr_j = nbr_ref[j, :, :].astype(jnp.float32)            # (C, tp)
            h = jnp.dot(w_nbr, nbr_j, preferred_element_type=jnp.float32)
            h = jnp.maximum(h + shared, 0.0)        # relu_ always on stage 0
            acc_ref[j, row:row + g, :] = h

        # ---- stages 1 .. n-1 (last stage has no relu) ---------------------
        for i in range(1, n_mlps):
            w_h = params[3 * i][...]                                # (g, i*g)
            w_x = params[3 * i + 1][...]                            # (g, C)
            b_i = params[3 * i + 2][...]                            # (g, 1)
            shared = jnp.dot(w_x, ctr, preferred_element_type=jnp.float32) + b_i
            lo = (n_mlps - i) * g
            row = (n_mlps - 1 - i) * g
            for j in range(k):
                y = acc_ref[j, lo:n_mlps * g, :]                    # (i*g, tp)
                h = jnp.dot(w_h, y, preferred_element_type=jnp.float32) + shared
                if i != n_mlps - 1:
                    h = jnp.maximum(h, 0.0)
                acc_ref[j, row:row + g, :] = h

        # ---- max over k neighbours; append the centre (x_rep) channels ----
        m = acc_ref[0, :, :]
        for j in range(1, k):
            m = jnp.maximum(m, acc_ref[j, :, :])
        out_ref[0:n_mlps * g, :] = m
        out_ref[n_mlps * g:, :] = ctr          # max over k copies of x == x

    return kernel


def _knn_indices(x, k):
    """x: (B, C, N) -> kNN indices (B, N, k), self excluded (nearest first)."""
    xt = jnp.transpose(x, (0, 2, 1))
    sq = jnp.sum(xt * xt, axis=-1)
    d2 = sq[:, :, None] + sq[:, None, :] - 2.0 * jnp.einsum('bic,bjc->bij', xt, xt)
    _, idx = jax.lax.top_k(-d2, k + 1)
    return idx[:, :, 1:]


def _vmem_limit_bytes():
    # Raise the scoped-VMEM limit (16/32 MiB default) so large point tiles can
    # double-buffer; stay well under v7x's 64 MiB physical VMEM.
    try:
        phys = int(pltpu.get_tpu_info().vmem_capacity_bytes)
    except Exception:
        phys = 128 * 1024 * 1024
    return int(min(96 * 1024 * 1024, max(32 * 1024 * 1024, phys * 3 // 4)))


def dc_edgeconv_forward(x, fused_params, k, idx=None, tile_p=512,
                        in_dtype=jnp.bfloat16):
    """DC_Edgeconv forward.

    x            : (B, C, N) float32, channels-first (PyTorch layout).
    fused_params : list of n tuples (W (g, c_in), b (g,)) with conv1x1 + BN
                   (eval mode) already fused.
    returns      : (B, C + n*growth, N) float32.
    """
    B, C, N = x.shape
    n = len(fused_params)
    g = fused_params[0][0].shape[0]
    c_out = C + n * g

    # --- glue (stays in XLA): kNN graph + neighbour gather ------------------
    if idx is None:
        idx = _knn_indices(x, k)
    xt = jnp.transpose(x, (0, 2, 1))                           # (B, N, C)
    knn = jax.vmap(lambda pts, ids: pts[ids])(xt, idx)         # (B, N, k, C)

    # --- lane-dense, points-in-lanes operands --------------------------------
    P = B * N
    tile_p = max(128, _round_up(min(tile_p, _round_up(P, 128)), 128))
    P_total = _round_up(P, tile_p)
    pad = P_total - P

    nbr = jnp.transpose(knn, (2, 3, 0, 1)).reshape(k, C, P)    # (k, C, P)
    ctr = jnp.transpose(xt, (2, 0, 1)).reshape(C, P)           # (C, P)
    if pad:
        nbr = jnp.pad(nbr, ((0, 0), (0, 0), (0, pad)))
        ctr = jnp.pad(ctr, ((0, 0), (0, pad)))
    nbr = nbr.astype(in_dtype)   # bf16 in HBM; all in-kernel math stays f32
    ctr = ctr.astype(in_dtype)

    # --- re-split fused weights for the in-kernel formulation ----------------
    #  stage 0: W @ [x, nn-x] == (W[:, :C] - W[:, C:]) @ x + W[:, C:] @ nn
    #  stage i: W @ [h_{i-1}..h_0, x] == W[:, :i*g] @ h + W[:, i*g:] @ x
    flat_params, param_specs = [], []

    def _add(p):
        p = p.astype(jnp.float32)
        flat_params.append(p)
        param_specs.append(pl.BlockSpec(p.shape, lambda i: (0, 0)))

    W0, b0 = fused_params[0]
    _add(W0[:, :C] - W0[:, C:])
    _add(W0[:, C:])
    _add(b0.reshape(g, 1))
    for i in range(1, n):
        Wi, bi = fused_params[i]
        _add(Wi[:, :i * g])
        _add(Wi[:, i * g:])
        _add(bi.reshape(g, 1))

    grid = (P_total // tile_p,)
    out = pl.pallas_call(
        _make_kernel(n, k, g),
        out_shape=jax.ShapeDtypeStruct((c_out, P_total), jnp.float32),
        grid=grid,
        in_specs=[pl.BlockSpec((k, C, tile_p), lambda i: (0, 0, i)),
                  pl.BlockSpec((C, tile_p), lambda i: (0, i))] + param_specs,
        out_specs=pl.BlockSpec((c_out, tile_p), lambda i: (0, i)),
        scratch_shapes=[pltpu.VMEM((k, n * g, tile_p), jnp.float32)],
        compiler_params=pltpu.CompilerParams(
            dimension_semantics=("parallel",),
            vmem_limit_bytes=_vmem_limit_bytes()),
    )(nbr, ctr, *flat_params)

    out = out[:, :P].reshape(c_out, B, N)                      # drop lane padding
    return jnp.transpose(out, (1, 0, 2))                       # (B, c_out, N)


# ---------------- deterministic parameter init & conv+BN fusion -------------
def init_params(key, in_channels, growth_rate, n):
    convs, bns = [], []
    c_in = 2 * in_channels
    for i in range(n):
        key, kw, kg, kb, km, kv = jax.random.split(key, 6)
        W = 0.3 * jax.random.normal(kw, (growth_rate, c_in), jnp.float32)
        gamma = 1.0 + 0.1 * jax.random.normal(kg, (growth_rate,), jnp.float32)
        beta = 0.1 * jax.random.normal(kb, (growth_rate,), jnp.float32)
        mean = 0.1 * jax.random.normal(km, (growth_rate,), jnp.float32)
        var = 1.0 + 0.2 * jax.random.uniform(kv, (growth_rate,), jnp.float32)
        convs.append(W)
        bns.append((gamma, beta, mean, var))
        c_in = in_channels + (i + 1) * growth_rate
    return convs, bns


def fuse_conv_bn(convs, bns, eps=1e-5):
    fused = []
    for W, (gamma, beta, mean, var) in zip(convs, bns):
        scale = gamma / jnp.sqrt(var + eps)
        Wf = W * scale[:, None]            # (g, c_in)
        bf = beta - mean * scale           # (g,)
        fused.append((Wf, bf))
    return fused


# ---------------- pure-JAX reference (mirrors PyTorch NCHW math) ------------
def reference_forward(x, convs, bns, k, eps=1e-5):
    B, C, N = x.shape
    idx = _knn_indices(x, k)
    xt = jnp.transpose(x, (0, 2, 1))
    knn = jax.vmap(lambda pts, ids: pts[ids])(xt, idx)         # (B, N, k, C)
    knn = jnp.transpose(knn, (0, 3, 1, 2))                     # (B, C, N, k)
    center = jnp.broadcast_to(x[:, :, :, None], knn.shape)
    y = jnp.concatenate([center, knn - center], axis=1)        # (B, 2C, N, k)
    xrep = jnp.broadcast_to(x[:, :, :, None], (B, C, N, k))
    n = len(convs)
    for i in range(n):
        W = convs[i]
        gamma, beta, mean, var = bns[i]
        h = jnp.einsum('oc,bcnk->bonk', W, y)
        h = (gamma[None, :, None, None] * (h - mean[None, :, None, None])
             / jnp.sqrt(var + eps)[None, :, None, None]
             + beta[None, :, None, None])
        if i == 0:
            y = jnp.concatenate([jnp.maximum(h, 0.0), xrep], axis=1)
        elif i == n - 1:
            y = jnp.concatenate([h, y], axis=1)
        else:
            y = jnp.concatenate([jnp.maximum(h, 0.0), y], axis=1)
    return jnp.max(y, axis=-1)                                 # (B, C_out, N)


if __name__ == "__main__":
    B, C, N = 2, 4, 16          # batch, input channels, number of points
    growth, n, k = 8, 3, 4      # growth_rate, number of dense mlps, kNN k

    key = jax.random.PRNGKey(0)
    kx1, kx2, kp = jax.random.split(key, 3)

    convs, bns = init_params(kp, C, growth, n)
    fused = fuse_conv_bn(convs, bns)

    # Tolerances cover the bf16 rounding of the HBM-side point features
    # (all in-kernel math is f32).

    # case 1: tiny shape, single grid step
    x1 = jax.random.normal(kx1, (B, C, N), jnp.float32)
    out1 = jax.block_until_ready(dc_edgeconv_forward(x1, fused, k))
    ref1 = reference_forward(x1, convs, bns, k)
    assert out1.shape == (B, C + n * growth, N), out1.shape
    if not jnp.allclose(out1, ref1, atol=5e-2, rtol=5e-2):
        raise AssertionError("Pallas kernel output does not match reference (case 1)")

    # case 2: multiple point tiles + lane padding (grid > 1)
    N2, k2 = 200, 6
    x2 = jax.random.normal(kx2, (B, C, N2), jnp.float32)
    out2 = jax.block_until_ready(dc_edgeconv_forward(x2, fused, k2, tile_p=128))
    ref2 = reference_forward(x2, convs, bns, k2)
    assert out2.shape == (B, C + n * growth, N2), out2.shape
    if not jnp.allclose(out2, ref2, atol=5e-2, rtol=5e-2):
        raise AssertionError("Pallas kernel output does not match reference (case 2)")

    print("KERNEL_OK")
</pallas_src>

<mosaic_0001>
module attributes {stable_mosaic.version = 11 : i64} {
  func.func @kernel(%arg0: i32, %arg1: memref<4x4x128xbf16, #tpu.memory_space<vmem>>, %arg2: memref<4x128xbf16, #tpu.memory_space<vmem>>, %arg3: memref<8x4xf32, #tpu.memory_space<vmem>>, %arg4: memref<8x4xf32, #tpu.memory_space<vmem>>, %arg5: memref<8x1xf32, #tpu.memory_space<vmem>>, %arg6: memref<8x8xf32, #tpu.memory_space<vmem>>, %arg7: memref<8x4xf32, #tpu.memory_space<vmem>>, %arg8: memref<8x1xf32, #tpu.memory_space<vmem>>, %arg9: memref<8x16xf32, #tpu.memory_space<vmem>>, %arg10: memref<8x4xf32, #tpu.memory_space<vmem>>, %arg11: memref<8x1xf32, #tpu.memory_space<vmem>>, %arg12: memref<28x128xf32, #tpu.memory_space<vmem>>, %arg13: memref<4x24x128xf32, #tpu.memory_space<vmem>>) attributes {dimension_semantics = [#tpu.dimension_semantics<parallel>], iteration_bounds = array<i64: 1>, scalar_prefetch = 0 : i64, scratch_operands = 1 : i64, tpu.core_type = #tpu.core_type<tc>, window_params = [{transform_indices = @transform_0, window_bounds = array<i64: 4, 4, 128>}, {transform_indices = @transform_1, window_bounds = array<i64: 4, 128>}, {pipeline_mode = #tpu.pipeline_mode<synchronous>, transform_indices = @transform_2, window_bounds = array<i64: 8, 4>}, {pipeline_mode = #tpu.pipeline_mode<synchronous>, transform_indices = @transform_3, window_bounds = array<i64: 8, 4>}, {pipeline_mode = #tpu.pipeline_mode<synchronous>, transform_indices = @transform_4, window_bounds = array<i64: 8, 1>}, {pipeline_mode = #tpu.pipeline_mode<synchronous>, transform_indices = @transform_5, window_bounds = array<i64: 8, 8>}, {pipeline_mode = #tpu.pipeline_mode<synchronous>, transform_indices = @transform_6, window_bounds = array<i64: 8, 4>}, {pipeline_mode = #tpu.pipeline_mode<synchronous>, transform_indices = @transform_7, window_bounds = array<i64: 8, 1>}, {pipeline_mode = #tpu.pipeline_mode<synchronous>, transform_indices = @transform_8, window_bounds = array<i64: 8, 16>}, {pipeline_mode = #tpu.pipeline_mode<synchronous>, transform_indices = @transform_9, window_bounds = array<i64: 8, 4>}, {pipeline_mode = #tpu.pipeline_mode<synchronous>, transform_indices = @transform_10, window_bounds = array<i64: 8, 1>}, {transform_indices = @transform_11, window_bounds = array<i64: 28, 128>}]} {
    %c0 = arith.constant 0 : index
    %c0_0 = arith.constant 0 : index
    %0 = vector.load %arg2[%c0, %c0_0] : memref<4x128xbf16, #tpu.memory_space<vmem>>, vector<4x128xbf16>
    %1 = arith.extf %0 : vector<4x128xbf16> to vector<4x128xf32>
    %c0_1 = arith.constant 0 : index
    %c0_2 = arith.constant 0 : index
    %2 = vector.load %arg3[%c0_1, %c0_2] : memref<8x4xf32, #tpu.memory_space<vmem>>, vector<8x4xf32>
    %c0_3 = arith.constant 0 : index
    %c0_4 = arith.constant 0 : index
    %3 = vector.load %arg4[%c0_3, %c0_4] : memref<8x4xf32, #tpu.memory_space<vmem>>, vector<8x4xf32>
    %c0_5 = arith.constant 0 : index
    %c0_6 = arith.constant 0 : index
    %4 = vector.load %arg5[%c0_5, %c0_6] : memref<8x1xf32, #tpu.memory_space<vmem>>, vector<8x1xf32>
    %cst = arith.constant dense<0.000000e+00> : vector<8x128xf32>
    %5 = tpu.matmul %2, %1, %cst {dimension_numbers = #tpu.dot_dimension_numbers<[1], [0], [0], [1], [0, 0, 1, 1], [], []>} : vector<8x4xf32>, vector<4x128xf32>, vector<8x128xf32> -> vector<8x128xf32>
    %6 = vector.broadcast %4 : vector<8x1xf32> to vector<8x128xf32>
    %7 = arith.addf %5, %6 : vector<8x128xf32>
    %c0_7 = arith.constant 0 : index
    %c0_8 = arith.constant 0 : index
    %c0_9 = arith.constant 0 : index
    %8 = vector.load %arg1[%c0_7, %c0_8, %c0_9] : memref<4x4x128xbf16, #tpu.memory_space<vmem>>, vector<1x4x128xbf16>
    %9 = vector.shape_cast %8 : vector<1x4x128xbf16> to vector<4x128xbf16>
    %10 = arith.extf %9 : vector<4x128xbf16> to vector<4x128xf32>
    %cst_10 = arith.constant dense<0.000000e+00> : vector<8x128xf32>
    %11 = tpu.matmul %3, %10, %cst_10 {dimension_numbers = #tpu.dot_dimension_numbers<[1], [0], [0], [1], [0, 0, 1, 1], [], []>} : vector<8x4xf32>, vector<4x128xf32>, vector<8x128xf32> -> vector<8x128xf32>
    %12 = arith.addf %11, %7 : vector<8x128xf32>
    %cst_11 = arith.constant 0.000000e+00 : f32
    %13 = vector.broadcast %cst_11 : f32 to vector<8x128xf32>
    %14 = arith.maximumf %12, %13 : vector<8x128xf32>
    %c0_12 = arith.constant 0 : index
    %c16 = arith.constant 16 : index
    %c0_13 = arith.constant 0 : index
    %15 = vector.load %arg13[%c0_12, %c16, %c0_13] : memref<4x24x128xf32, #tpu.memory_space<vmem>>, vector<1x8x128xf32>
    %16 = vector.shape_cast %15 : vector<1x8x128xf32> to vector<8x128xf32>
    %17 = vector.shape_cast %14 : vector<8x128xf32> to vector<1x8x128xf32>
    tpu.vector_store %arg13[%c0_12, %c16, %c0_13], %17 {strides = array<i32>} : memref<4x24x128xf32, #tpu.memory_space<vmem>>, vector<1x8x128xf32>,
    %c1 = arith.constant 1 : index
    %c0_14 = arith.constant 0 : index
    %c0_15 = arith.constant 0 : index
    %18 = vector.load %arg1[%c1, %c0_14, %c0_15] : memref<4x4x128xbf16, #tpu.memory_space<vmem>>, vector<1x4x128xbf16>
    %19 = vector.shape_cast %18 : vector<1x4x128xbf16> to vector<4x128xbf16>
    %20 = arith.extf %19 : vector<4x128xbf16> to vector<4x128xf32>
    %cst_16 = arith.constant dense<0.000000e+00> : vector<8x128xf32>
    %21 = tpu.matmul %3, %20, %cst_16 {dimension_numbers = #tpu.dot_dimension_numbers<[1], [0], [0], [1], [0, 0, 1, 1], [], []>} : vector<8x4xf32>, vector<4x128xf32>, vector<8x128xf32> -> vector<8x128xf32>
    %22 = arith.addf %21, %7 : vector<8x128xf32>
    %cst_17 = arith.constant 0.000000e+00 : f32
    %23 = vector.broadcast %cst_17 : f32 to vector<8x128xf32>
    %24 = arith.maximumf %22, %23 : vector<8x128xf32>
    %c1_18 = arith.constant 1 : index
    %c16_19 = arith.constant 16 : index
    %c0_20 = arith.constant 0 : index
    %25 = vector.load %arg13[%c1_18, %c16_19, %c0_20] : memref<4x24x128xf32, #tpu.memory_space<vmem>>, vector<1x8x128xf32>
    %26 = vector.shape_cast %25 : vector<1x8x128xf32> to vector<8x128xf32>
    %27 = vector.shape_cast %24 : vector<8x128xf32> to vector<1x8x128xf32>
    tpu.vector_store %arg13[%c1_18, %c16_19, %c0_20], %27 {strides = array<i32>} : memref<4x24x128xf32, #tpu.memory_space<vmem>>, vector<1x8x128xf32>,
    %c2 = arith.constant 2 : index
    %c0_21 = arith.constant 0 : index
    %c0_22 = arith.constant 0 : index
    %28 = vector.load %arg1[%c2, %c0_21, %c0_22] : memref<4x4x128xbf16, #tpu.memory_space<vmem>>, vector<1x4x128xbf16>
    %29 = vector.shape_cast %28 : vector<1x4x128xbf16> to vector<4x128xbf16>
    %30 = arith.extf %29 : vector<4x128xbf16> to vector<4x128xf32>
    %cst_23 = arith.constant dense<0.000000e+00> : vector<8x128xf32>
    %31 = tpu.matmul %3, %30, %cst_23 {dimension_numbers = #tpu.dot_dimension_numbers<[1], [0], [0], [1], [0, 0, 1, 1], [], []>} : vector<8x4xf32>, vector<4x128xf32>, vector<8x128xf32> -> vector<8x128xf32>
    %32 = arith.addf %31, %7 : vector<8x128xf32>
    %cst_24 = arith.constant 0.000000e+00 : f32
    %33 = vector.broadcast %cst_24 : f32 to vector<8x128xf32>
    %34 = arith.maximumf %32, %33 : vector<8x128xf32>
    %c2_25 = arith.constant 2 : index
    %c16_26 = arith.constant 16 : index
    %c0_27 = arith.constant 0 : index
    %35 = vector.load %arg13[%c2_25, %c16_26, %c0_27] : memref<4x24x128xf32, #tpu.memory_space<vmem>>, vector<1x8x128xf32>
    %36 = vector.shape_cast %35 : vector<1x8x128xf32> to vector<8x128xf32>
    %37 = vector.shape_cast %34 : vector<8x128xf32> to vector<1x8x128xf32>
    tpu.vector_store %arg13[%c2_25, %c16_26, %c0_27], %37 {strides = array<i32>} : memref<4x24x128xf32, #tpu.memory_space<vmem>>, vector<1x8x128xf32>,
    %c3 = arith.constant 3 : index
    %c0_28 = arith.constant 0 : index
    %c0_29 = arith.constant 0 : index
    %38 = vector.load %arg1[%c3, %c0_28, %c0_29] : memref<4x4x128xbf16, #tpu.memory_space<vmem>>, vector<1x4x128xbf16>
    %39 = vector.shape_cast %38 : vector<1x4x128xbf16> to vector<4x128xbf16>
    %40 = arith.extf %39 : vector<4x128xbf16> to vector<4x128xf32>
    %cst_30 = arith.constant dense<0.000000e+00> : vector<8x128xf32>
    %41 = tpu.matmul %3, %40, %cst_30 {dimension_numbers = #tpu.dot_dimension_numbers<[1], [0], [0], [1], [0, 0, 1, 1], [], []>} : vector<8x4xf32>, vector<4x128xf32>, vector<8x128xf32> -> vector<8x128xf32>
    %42 = arith.addf %41, %7 : vector<8x128xf32>
    %cst_31 = arith.constant 0.000000e+00 : f32
    %43 = vector.broadcast %cst_31 : f32 to vector<8x128xf32>
    %44 = arith.maximumf %42, %43 : vector<8x128xf32>
    %c3_32 = arith.constant 3 : index
    %c16_33 = arith.constant 16 : index
    %c0_34 = arith.constant 0 : index
    %45 = vector.load %arg13[%c3_32, %c16_33, %c0_34] : memref<4x24x128xf32, #tpu.memory_space<vmem>>, vector<1x8x128xf32>
    %46 = vector.shape_cast %45 : vector<1x8x128xf32> to vector<8x128xf32>
    %47 = vector.shape_cast %44 : vector<8x128xf32> to vector<1x8x128xf32>
    tpu.vector_store %arg13[%c3_32, %c16_33, %c0_34], %47 {strides = array<i32>} : memref<4x24x128xf32, #tpu.memory_space<vmem>>, vector<1x8x128xf32>,
    %c0_35 = arith.constant 0 : index
    %c0_36 = arith.constant 0 : index
    %48 = vector.load %arg6[%c0_35, %c0_36] : memref<8x8xf32, #tpu.memory_space<vmem>>, vector<8x8xf32>
    %c0_37 = arith.constant 0 : index
    %c0_38 = arith.constant 0 : index
    %49 = vector.load %arg7[%c0_37, %c0_38] : memref<8x4xf32, #tpu.memory_space<vmem>>, vector<8x4xf32>
    %c0_39 = arith.constant 0 : index
    %c0_40 = arith.constant 0 : index
    %50 = vector.load %arg8[%c0_39, %c0_40] : memref<8x1xf32, #tpu.memory_space<vmem>>, vector<8x1xf32>
    %cst_41 = arith.constant dense<0.000000e+00> : vector<8x128xf32>
    %51 = tpu.matmul %49, %1, %cst_41 {dimension_numbers = #tpu.dot_dimension_numbers<[1], [0], [0], [1], [0, 0, 1, 1], [], []>} : vector<8x4xf32>, vector<4x128xf32>, vector<8x128xf32> -> vector<8x128xf32>
    %52 = vector.broadcast %50 : vector<8x1xf32> to vector<8x128xf32>
    %53 = arith.addf %51, %52 : vector<8x128xf32>
    %c0_42 = arith.constant 0 : index
    %c16_43 = arith.constant 16 : index
    %c0_44 = arith.constant 0 : index
    %54 = vector.load %arg13[%c0_42, %c16_43, %c0_44] : memref<4x24x128xf32, #tpu.memory_space<vmem>>, vector<1x8x128xf32>
    %55 = vector.shape_cast %54 : vector<1x8x128xf32> to vector<8x128xf32>
    %cst_45 = arith.constant dense<0.000000e+00> : vector<8x128xf32>
    %56 = tpu.matmul %48, %55, %cst_45 {dimension_numbers = #tpu.dot_dimension_numbers<[1], [0], [0], [1], [0, 0, 1, 1], [], []>} : vector<8x8xf32>, vector<8x128xf32>, vector<8x128xf32> -> vector<8x128xf32>
    %57 = arith.addf %56, %53 : vector<8x128xf32>
    %cst_46 = arith.constant 0.000000e+00 : f32
    %58 = vector.broadcast %cst_46 : f32 to vector<8x128xf32>
    %59 = arith.maximumf %57, %58 : vector<8x128xf32>
    %c0_47 = arith.constant 0 : index
    %c8 = arith.constant 8 : index
    %c0_48 = arith.constant 0 : index
    %60 = vector.load %arg13[%c0_47, %c8, %c0_48] : memref<4x24x128xf32, #tpu.memory_space<vmem>>, vector<1x8x128xf32>
    %61 = vector.shape_cast %60 : vector<1x8x128xf32> to vector<8x128xf32>
    %62 = vector.shape_cast %59 : vector<8x128xf32> to vector<1x8x128xf32>
    tpu.vector_store %arg13[%c0_47, %c8, %c0_48], %62 {strides = array<i32>} : memref<4x24x128xf32, #tpu.memory_space<vmem>>, vector<1x8x128xf32>,
    %c1_49 = arith.constant 1 : index
    %c16_50 = arith.constant 16 : index
    %c0_51 = arith.constant 0 : index
    %63 = vector.load %arg13[%c1_49, %c16_50, %c0_51] : memref<4x24x128xf32, #tpu.memory_space<vmem>>, vector<1x8x128xf32>
    %64 = vector.shape_cast %63 : vector<1x8x128xf32> to vector<8x128xf32>
    %cst_52 = arith.constant dense<0.000000e+00> : vector<8x128xf32>
    %65 = tpu.matmul %48, %64, %cst_52 {dimension_numbers = #tpu.dot_dimension_numbers<[1], [0], [0], [1], [0, 0, 1, 1], [], []>} : vector<8x8xf32>, vector<8x128xf32>, vector<8x128xf32> -> vector<8x128xf32>
    %66 = arith.addf %65, %53 : vector<8x128xf32>
    %cst_53 = arith.constant 0.000000e+00 : f32
    %67 = vector.broadcast %cst_53 : f32 to vector<8x128xf32>
    %68 = arith.maximumf %66, %67 : vector<8x128xf32>
    %c1_54 = arith.constant 1 : index
    %c8_55 = arith.constant 8 : index
    %c0_56 = arith.constant 0 : index
    %69 = vector.load %arg13[%c1_54, %c8_55, %c0_56] : memref<4x24x128xf32, #tpu.memory_space<vmem>>, vector<1x8x128xf32>
    %70 = vector.shape_cast %69 : vector<1x8x128xf32> to vector<8x128xf32>
    %71 = vector.shape_cast %68 : vector<8x128xf32> to vector<1x8x128xf32>
    tpu.vector_store %arg13[%c1_54, %c8_55, %c0_56], %71 {strides = array<i32>} : memref<4x24x128xf32, #tpu.memory_space<vmem>>, vector<1x8x128xf32>,
    %c2_57 = arith.constant 2 : index
    %c16_58 = arith.constant 16 : index
    %c0_59 = arith.constant 0 : index
    %72 = vector.load %arg13[%c2_57, %c16_58, %c0_59] : memref<4x24x128xf32, #tpu.memory_space<vmem>>, vector<1x8x128xf32>
    %73 = vector.shape_cast %72 : vector<1x8x128xf32> to vector<8x128xf32>
    %cst_60 = arith.constant dense<0.000000e+00> : vector<8x128xf32>
    %74 = tpu.matmul %48, %73, %cst_60 {dimension_numbers = #tpu.dot_dimension_numbers<[1], [0], [0], [1], [0, 0, 1, 1], [], []>} : vector<8x8xf32>, vector<8x128xf32>, vector<8x128xf32> -> vector<8x128xf32>
    %75 = arith.addf %74, %53 : vector<8x128xf32>
    %cst_61 = arith.constant 0.000000e+00 : f32
    %76 = vector.broadcast %cst_61 : f32 to vector<8x128xf32>
    %77 = arith.maximumf %75, %76 : vector<8x128xf32>
    %c2_62 = arith.constant 2 : index
    %c8_63 = arith.constant 8 : index
    %c0_64 = arith.constant 0 : index
    %78 = vector.load %arg13[%c2_62, %c8_63, %c0_64] : memref<4x24x128xf32, #tpu.memory_space<vmem>>, vector<1x8x128xf32>
    %79 = vector.shape_cast %78 : vector<1x8x128xf32> to vector<8x128xf32>
    %80 = vector.shape_cast %77 : vector<8x128xf32> to vector<1x8x128xf32>
    tpu.vector_store %arg13[%c2_62, %c8_63, %c0_64], %80 {strides = array<i32>} : memref<4x24x128xf32, #tpu.memory_space<vmem>>, vector<1x8x128xf32>,
    %c3_65 = arith.constant 3 : index
    %c16_66 = arith.constant 16 : index
    %c0_67 = arith.constant 0 : index
    %81 = vector.load %arg13[%c3_65, %c16_66, %c0_67] : memref<4x24x128xf32, #tpu.memory_space<vmem>>, vector<1x8x128xf32>
    %82 = vector.shape_cast %81 : vector<1x8x128xf32> to vector<8x128xf32>
    %cst_68 = arith.constant dense<0.000000e+00> : vector<8x128xf32>
    %83 = tpu.matmul %48, %82, %cst_68 {dimension_numbers = #tpu.dot_dimension_numbers<[1], [0], [0], [1], [0, 0, 1, 1], [], []>} : vector<8x8xf32>, vector<8x128xf32>, vector<8x128xf32> -> vector<8x128xf32>
    %84 = arith.addf %83, %53 : vector<8x128xf32>
    %cst_69 = arith.constant 0.000000e+00 : f32
    %85 = vector.broadcast %cst_69 : f32 to vector<8x128xf32>
    %86 = arith.maximumf %84, %85 : vector<8x128xf32>
    %c3_70 = arith.constant 3 : index
    %c8_71 = arith.constant 8 : index
    %c0_72 = arith.constant 0 : index
    %87 = vector.load %arg13[%c3_70, %c8_71, %c0_72] : memref<4x24x128xf32, #tpu.memory_space<vmem>>, vector<1x8x128xf32>
    %88 = vector.shape_cast %87 : vector<1x8x128xf32> to vector<8x128xf32>
    %89 = vector.shape_cast %86 : vector<8x128xf32> to vector<1x8x128xf32>
    tpu.vector_store %arg13[%c3_70, %c8_71, %c0_72], %89 {strides = array<i32>} : memref<4x24x128xf32, #tpu.memory_space<vmem>>, vector<1x8x128xf32>,
    %c0_73 = arith.constant 0 : index
    %c0_74 = arith.constant 0 : index
    %90 = vector.load %arg9[%c0_73, %c0_74] : memref<8x16xf32, #tpu.memory_space<vmem>>, vector<8x16xf32>
    %c0_75 = arith.constant 0 : index
    %c0_76 = arith.constant 0 : index
    %91 = vector.load %arg10[%c0_75, %c0_76] : memref<8x4xf32, #tpu.memory_space<vmem>>, vector<8x4xf32>
    %c0_77 = arith.constant 0 : index
    %c0_78 = arith.constant 0 : index
    %92 = vector.load %arg11[%c0_77, %c0_78] : memref<8x1xf32, #tpu.memory_space<vmem>>, vector<8x1xf32>
    %cst_79 = arith.constant dense<0.000000e+00> : vector<8x128xf32>
    %93 = tpu.matmul %91, %1, %cst_79 {dimension_numbers = #tpu.dot_dimension_numbers<[1], [0], [0], [1], [0, 0, 1, 1], [], []>} : vector<8x4xf32>, vector<4x128xf32>, vector<8x128xf32> -> vector<8x128xf32>
    %94 = vector.broadcast %92 : vector<8x1xf32> to vector<8x128xf32>
    %95 = arith.addf %93, %94 : vector<8x128xf32>
    %c0_80 = arith.constant 0 : index
    %c8_81 = arith.constant 8 : index
    %c0_82 = arith.constant 0 : index
    %96 = vector.load %arg13[%c0_80, %c8_81, %c0_82] : memref<4x24x128xf32, #tpu.memory_space<vmem>>, vector<1x16x128xf32>
    %97 = vector.shape_cast %96 : vector<1x16x128xf32> to vector<16x128xf32>
    %cst_83 = arith.constant dense<0.000000e+00> : vector<8x128xf32>
    %98 = tpu.matmul %90, %97, %cst_83 {dimension_numbers = #tpu.dot_dimension_numbers<[1], [0], [0], [1], [0, 0, 1, 1], [], []>} : vector<8x16xf32>, vector<16x128xf32>, vector<8x128xf32> -> vector<8x128xf32>
    %99 = arith.addf %98, %95 : vector<8x128xf32>
    %c0_84 = arith.constant 0 : index
    %c0_85 = arith.constant 0 : index
    %c0_86 = arith.constant 0 : index
    %100 = vector.load %arg13[%c0_84, %c0_85, %c0_86] : memref<4x24x128xf32, #tpu.memory_space<vmem>>, vector<1x8x128xf32>
    %101 = vector.shape_cast %100 : vector<1x8x128xf32> to vector<8x128xf32>
    %102 = vector.shape_cast %99 : vector<8x128xf32> to vector<1x8x128xf32>
    tpu.vector_store %arg13[%c0_84, %c0_85, %c0_86], %102 {strides = array<i32>} : memref<4x24x128xf32, #tpu.memory_space<vmem>>, vector<1x8x128xf32>,
    %c1_87 = arith.constant 1 : index
    %c8_88 = arith.constant 8 : index
    %c0_89 = arith.constant 0 : index
    %103 = vector.load %arg13[%c1_87, %c8_88, %c0_89] : memref<4x24x128xf32, #tpu.memory_space<vmem>>, vector<1x16x128xf32>
    %104 = vector.shape_cast %103 : vector<1x16x128xf32> to vector<16x128xf32>
    %cst_90 = arith.constant dense<0.000000e+00> : vector<8x128xf32>
    %105 = tpu.matmul %90, %104, %cst_90 {dimension_numbers = #tpu.dot_dimension_numbers<[1], [0], [0], [1], [0, 0, 1, 1], [], []>} : vector<8x16xf32>, vector<16x128xf32>, vector<8x128xf32> -> vector<8x128xf32>
    %106 = arith.addf %105, %95 : vector<8x128xf32>
    %c1_91 = arith.constant 1 : index
    %c0_92 = arith.constant 0 : index
    %c0_93 = arith.constant 0 : index
    %107 = vector.load %arg13[%c1_91, %c0_92, %c0_93] : memref<4x24x128xf32, #tpu.memory_space<vmem>>, vector<1x8x128xf32>
    %108 = vector.shape_cast %107 : vector<1x8x128xf32> to vector<8x128xf32>
    %109 = vector.shape_cast %106 : vector<8x128xf32> to vector<1x8x128xf32>
    tpu.vector_store %arg13[%c1_91, %c0_92, %c0_93], %109 {strides = array<i32>} : memref<4x24x128xf32, #tpu.memory_space<vmem>>, vector<1x8x128xf32>,
    %c2_94 = arith.constant 2 : index
    %c8_95 = arith.constant 8 : index
    %c0_96 = arith.constant 0 : index
    %110 = vector.load %arg13[%c2_94, %c8_95, %c0_96] : memref<4x24x128xf32, #tpu.memory_space<vmem>>, vector<1x16x128xf32>
    %111 = vector.shape_cast %110 : vector<1x16x128xf32> to vector<16x128xf32>
    %cst_97 = arith.constant dense<0.000000e+00> : vector<8x128xf32>
    %112 = tpu.matmul %90, %111, %cst_97 {dimension_numbers = #tpu.dot_dimension_numbers<[1], [0], [0], [1], [0, 0, 1, 1], [], []>} : vector<8x16xf32>, vector<16x128xf32>, vector<8x128xf32> -> vector<8x128xf32>
    %113 = arith.addf %112, %95 : vector<8x128xf32>
    %c2_98 = arith.constant 2 : index
    %c0_99 = arith.constant 0 : index
    %c0_100 = arith.constant 0 : index
    %114 = vector.load %arg13[%c2_98, %c0_99, %c0_100] : memref<4x24x128xf32, #tpu.memory_space<vmem>>, vector<1x8x128xf32>
    %115 = vector.shape_cast %114 : vector<1x8x128xf32> to vector<8x128xf32>
    %116 = vector.shape_cast %113 : vector<8x128xf32> to vector<1x8x128xf32>
    tpu.vector_store %arg13[%c2_98, %c0_99, %c0_100], %116 {strides = array<i32>} : memref<4x24x128xf32, #tpu.memory_space<vmem>>, vector<1x8x128xf32>,
    %c3_101 = arith.constant 3 : index
    %c8_102 = arith.constant 8 : index
    %c0_103 = arith.constant 0 : index
    %117 = vector.load %arg13[%c3_101, %c8_102, %c0_103] : memref<4x24x128xf32, #tpu.memory_space<vmem>>, vector<1x16x128xf32>
    %118 = vector.shape_cast %117 : vector<1x16x128xf32> to vector<16x128xf32>
    %cst_104 = arith.constant dense<0.000000e+00> : vector<8x128xf32>
    %119 = tpu.matmul %90, %118, %cst_104 {dimension_numbers = #tpu.dot_dimension_numbers<[1], [0], [0], [1], [0, 0, 1, 1], [], []>} : vector<8x16xf32>, vector<16x128xf32>, vector<8x128xf32> -> vector<8x128xf32>
    %120 = arith.addf %119, %95 : vector<8x128xf32>
    %c3_105 = arith.constant 3 : index
    %c0_106 = arith.constant 0 : index
    %c0_107 = arith.constant 0 : index
    %121 = vector.load %arg13[%c3_105, %c0_106, %c0_107] : memref<4x24x128xf32, #tpu.memory_space<vmem>>, vector<1x8x128xf32>
    %122 = vector.shape_cast %121 : vector<1x8x128xf32> to vector<8x128xf32>
    %123 = vector.shape_cast %120 : vector<8x128xf32> to vector<1x8x128xf32>
    tpu.vector_store %arg13[%c3_105, %c0_106, %c0_107], %123 {strides = array<i32>} : memref<4x24x128xf32, #tpu.memory_space<vmem>>, vector<1x8x128xf32>,
    %c0_108 = arith.constant 0 : index
    %c0_109 = arith.constant 0 : index
    %c0_110 = arith.constant 0 : index
    %124 = vector.load %arg13[%c0_108, %c0_109, %c0_110] : memref<4x24x128xf32, #tpu.memory_space<vmem>>, vector<1x24x128xf32>
    %125 = vector.shape_cast %124 : vector<1x24x128xf32> to vector<24x128xf32>
    %c1_111 = arith.constant 1 : index
    %c0_112 = arith.constant 0 : index
    %c0_113 = arith.constant 0 : index
    %126 = vector.load %arg13[%c1_111, %c0_112, %c0_113] : memref<4x24x128xf32, #tpu.memory_space<vmem>>, vector<1x24x128xf32>
    %127 = vector.shape_cast %126 : vector<1x24x128xf32> to vector<24x128xf32>
    %128 = arith.maximumf %125, %127 : vector<24x128xf32>
    %c2_114 = arith.constant 2 : index
    %c0_115 = arith.constant 0 : index
    %c0_116 = arith.constant 0 : index
    %129 = vector.load %arg13[%c2_114, %c0_115, %c0_116] : memref<4x24x128xf32, #tpu.memory_space<vmem>>, vector<1x24x128xf32>
    %130 = vector.shape_cast %129 : vector<1x24x128xf32> to vector<24x128xf32>
    %131 = arith.maximumf %128, %130 : vector<24x128xf32>
    %c3_117 = arith.constant 3 : index
    %c0_118 = arith.constant 0 : index
    %c0_119 = arith.constant 0 : index
    %132 = vector.load %arg13[%c3_117, %c0_118, %c0_119] : memref<4x24x128xf32, #tpu.memory_space<vmem>>, vector<1x24x128xf32>
    %133 = vector.shape_cast %132 : vector<1x24x128xf32> to vector<24x128xf32>
    %134 = arith.maximumf %131, %133 : vector<24x128xf32>
    %c0_120 = arith.constant 0 : index
    %c0_121 = arith.constant 0 : index
    %135 = vector.load %arg12[%c0_120, %c0_121] : memref<28x128xf32, #tpu.memory_space<vmem>>, vector<24x128xf32>
    tpu.vector_store %arg12[%c0_120, %c0_121], %134 {strides = array<i32>} : memref<28x128xf32, #tpu.memory_space<vmem>>, vector<24x128xf32>,
    %c24 = arith.constant 24 : index
    %c0_122 = arith.constant 0 : index
    %136 = vector.load %arg12[%c24, %c0_122] : memref<28x128xf32, #tpu.memory_space<vmem>>, vector<4x128xf32>
    tpu.vector_store %arg12[%c24, %c0_122], %1 {strides = array<i32>} : memref<28x128xf32, #tpu.memory_space<vmem>>, vector<4x128xf32>,
    return
  }
  func.func @transform_0(%arg0: i32) -> (i32, i32, i32) {
    %c0_i32 = arith.constant 0 : i32
    %c0_i32_0 = arith.constant 0 : i32
    %c0_i32_1 = arith.constant 0 : i32
    return %c0_i32, %c0_i32_0, %arg0 : i32, i32, i32
  }
  func.func @transform_1(%arg0: i32) -> (i32, i32) {
    %c0_i32 = arith.constant 0 : i32
    %c0_i32_0 = arith.constant 0 : i32
    return %c0_i32, %arg0 : i32, i32
  }
  func.func @transform_2(%arg0: i32) -> (i32, i32) {
    %c0_i32 = arith.constant 0 : i32
    %c0_i32_0 = arith.constant 0 : i32
    %c0_i32_1 = arith.constant 0 : i32
    return %c0_i32, %c0_i32_0 : i32, i32
  }
  func.func @transform_3(%arg0: i32) -> (i32, i32) {
    %c0_i32 = arith.constant 0 : i32
    %c0_i32_0 = arith.constant 0 : i32
    %c0_i32_1 = arith.constant 0 : i32
    return %c0_i32, %c0_i32_0 : i32, i32
  }
  func.func @transform_4(%arg0: i32) -> (i32, i32) {
    %c0_i32 = arith.constant 0 : i32
    %c0_i32_0 = arith.constant 0 : i32
    %c0_i32_1 = arith.constant 0 : i32
    return %c0_i32, %c0_i32_0 : i32, i32
  }
  func.func @transform_5(%arg0: i32) -> (i32, i32) {
    %c0_i32 = arith.constant 0 : i32
    %c0_i32_0 = arith.constant 0 : i32
    %c0_i32_1 = arith.constant 0 : i32
    return %c0_i32, %c0_i32_0 : i32, i32
  }
  func.func @transform_6(%arg0: i32) -> (i32, i32) {
    %c0_i32 = arith.constant 0 : i32
    %c0_i32_0 = arith.constant 0 : i32
    %c0_i32_1 = arith.constant 0 : i32
    return %c0_i32, %c0_i32_0 : i32, i32
  }
  func.func @transform_7(%arg0: i32) -> (i32, i32) {
    %c0_i32 = arith.constant 0 : i32
    %c0_i32_0 = arith.constant 0 : i32
    %c0_i32_1 = arith.constant 0 : i32
    return %c0_i32, %c0_i32_0 : i32, i32
  }
  func.func @transform_8(%arg0: i32) -> (i32, i32) {
    %c0_i32 = arith.constant 0 : i32
    %c0_i32_0 = arith.constant 0 : i32
    %c0_i32_1 = arith.constant 0 : i32
    return %c0_i32, %c0_i32_0 : i32, i32
  }
  func.func @transform_9(%arg0: i32) -> (i32, i32) {
    %c0_i32 = arith.constant 0 : i32
    %c0_i32_0 = arith.constant 0 : i32
    %c0_i32_1 = arith.constant 0 : i32
    return %c0_i32, %c0_i32_0 : i32, i32
  }
  func.func @transform_10(%arg0: i32) -> (i32, i32) {
    %c0_i32 = arith.constant 0 : i32
    %c0_i32_0 = arith.constant 0 : i32
    %c0_i32_1 = arith.constant 0 : i32
    return %c0_i32, %c0_i32_0 : i32, i32
  }
  func.func @transform_11(%arg0: i32) -> (i32, i32) {
    %c0_i32 = arith.constant 0 : i32
    %c0_i32_0 = arith.constant 0 : i32
    return %c0_i32, %arg0 : i32, i32
  }
}

</mosaic_0001>

<bundles_post_ra>
// kernel: tpu_custom_call.1
= control target key start
LH: loop header
LB: loop body
LE: loop exit
PB: predicated region body
PF: predicated region fallthrough
CT: control target
= control target key end

     0   :  { %vm53_vm0 = vcmask 1043456   ;;  %vm49_vm1 = vcmask 31744   ;;  %s675_s0 = inlined_call_operand.vmem [shape: bf16[4,4,128], index: 0, kind: input, shape index: {}]   ;;  %s676_s1 = inlined_call_operand.vmem [shape: bf16[4,128], index: 1, kind: input, shape index: {}]   ;;  %s677_s2 = inlined_call_operand.vmem [shape: f32[8,4], index: 2, kind: input, shape index: {}]   ;;  %s678_s3 = inlined_call_operand.vmem [shape: f32[8,4], index: 3, kind: input, shape index: {}]   ;;  %s679_s4 = inlined_call_operand.vmem [shape: f32[8,1], index: 4, kind: input, shape index: {}]   ;;  %s680_s5 = inlined_call_operand.vmem [shape: f32[8,8], index: 5, kind: input, shape index: {}]   ;;  %s681_s6 = inlined_call_operand.vmem [shape: f32[8,4], index: 6, kind: input, shape index: {}]   ;;  %s682_s7 = inlined_call_operand.vmem [shape: f32[8,1], index: 7, kind: input, shape index: {}]   ;;  %s683_s8 = inlined_call_operand.vmem [shape: f32[8,16], index: 8, kind: input, shape index: {}]   ;;  %s684_s9 = inlined_call_operand.vmem [shape: f32[8,4], index: 9, kind: input, shape index: {}]   ;;  %s685_s10 = inlined_call_operand.vmem [shape: f32[8,1], index: 10, kind: input, shape index: {}]   ;;  %s686_s11 = inlined_call_operand.hbm [shape: f32[28,128], index: 11, kind: output, shape index: {}]  }
   0x1   :  { %v39_v0 = vld [vmem:[%s676_s1] sm:$0x3]  ;;  %v495_v4 = vld [vmem:[%s675_s0 + $0x2] sm:$0x3]  ;;  %v498_v5 = vld [vmem:[%s675_s0 + $0x4] sm:$0x3] }
   0x2   :  { %v77_v1 = vld [vmem:[%s675_s0] sm:$0x3]  ;;  %v40_v2 = vunpack.c.l.bf16 %v39_v0  ;;  %v109_v6 = vunpack.c.l.bf16 %v495_v4  ;;  %v138_v7 = vunpack.c.l.bf16 %v498_v5  ;;  %v501_v10 = vld [vmem:[%s675_s0 + $0x6] sm:$0x3] }
   0x3   :  { %v78_v3 = vunpack.c.l.bf16 %v77_v1  ;;  %v41_v8 = vld [vmem:[%s677_s2] sm:$0xff]  ;;  %v167_v11 = vunpack.c.l.bf16 %v501_v10 }
   0x4   :  { %v42_v9 = vld [vmem:[%s678_s3] sm:$0xff]  ;;  %491 = vmatpush.msk.msra.mxu0 %vm53_vm0, %v40_v2  ;;  %472 = vst [vmem:[#allocation3 + $0x18] sm:$0xf] %v40_v2 }
   0x5   :  { %493 = vmatpush.msk.msra.mxu1 %vm53_vm0, %v78_v3 }
   0x6   :  { %16 = vsyncpa [#allocation4], 0  ;;  %496 = vmatpush.msk.msra.mxu2 %vm53_vm0, %v109_v6  ;;  %499 = vmatpush.msk.msra.mxu3 %vm53_vm0, %v138_v7  ;;  %v43_v12 = vld [vmem:[%s679_s4] sm:$0xff]  ;;  %v548_v13 = vmov 0   ;;  %vm226_vm2 = vcmask 64512   ;;  %vm354_vm3 = vcmask 130048  }
   0x7   :  { %492 = vmatmul.msk.f32.vlgmr.msra.gmra.mxu0 %vm49_vm1, %v41_v8  ;;  %494 = vmatmul.msk.f32.vlgmr.msra.gmra.mxu1 %vm49_vm1, %v42_v9  ;;  %v195_v14 = vld [vmem:[%s681_s6] sm:$0xff]  ;;  %s479_s19 = sshll.u32 %s686_s11, 4  ;;  %s550_s20 = smov 128   ;;  %s480_s19 = int_to_ptr.hbm [resolvable:$true] %s479_s19 }
   0x8   :  { %497 = vmatmul.msk.f32.vlgmr.msra.gmra.mxu2 %vm49_vm1, %v42_v9  ;;  %500 = vmatmul.msk.f32.vlgmr.msra.gmra.mxu3 %vm49_vm1, %v42_v9  ;;  %v196_v15 = vld [vmem:[%s682_s7] sm:$0xff]  ;;  %s551_s21 = smov 8  }
   0x9   :  { %520 = vset.pattern.permute.xlu0 %v548_v13  ;;  %502 = vmatpush.msk.msrb.mxu0 %vm53_vm0, %v167_v11  ;;  %v194_v22 = vld [vmem:[%s680_s5] sm:$0xff] }
   0xa   :  { %46 = vperm.xlu0 %520, %v43_v12   ;;  %504 = vmatpush.msk.msrb.mxu1 %vm53_vm0, %v40_v2  ;;  %v322_v35 = vld [vmem:[%s684_s9] sm:$0xff] }
   0xb   :  { %521 = vset.pattern.permute.xlu1 %v548_v13  ;;  %v323_v36 = vld [vmem:[%s685_s10] sm:$0xff] }
   0xc   :  { %326 = vperm.xlu1 %521, %v323_v36   ;;  %v321_v48 = vld [vmem:[%s683_s8] sm:$0xff]  ;;  %s549_s8 = smov [#allocation3]  }
   0xd   :  { %s477_s10 = sshll.u32 %s549_s8, 4  ;;  %s478_s10 = int_to_ptr.vmem [resolvable:$true] %s477_s10 }
   0xf   :  { %503 = vmatmul.msk.f32.vlgmr.msrb.gmra.mxu0 %vm49_vm1, %v42_v9  ;;  %505 = vmatmul.msk.f32.vlgmr.msrb.gmra.mxu1 %vm49_vm1, %v195_v14 }
  0x12   :  { %199 = vperm.xlu0 %520, %v196_v15  }
  0x7c   :  { %v47_v16 = vpop.permute.xlu0 %46 }
  0x7e   :  { %v327_v57 = vpop.permute.xlu1 %326 }
  0x84   :  { %v74_v17 = vpop.f32.mrf.mxu0  ;;  %v102_v19 = vpop.f32.mrf.mxu1 }
  0x85   :  { %v75_v18 = vadd.f32 %v74_v17, %v47_v16  ;;  %v200_v38 = vpop.permute.xlu0 %199 }
  0x87   :  { %v103_v20 = vadd.f32 %v102_v19, %v75_v18 }
  0x89   :  { %v105_v21 = vmax.f32 %v103_v20, 0.0 }
  0x8b   :  { %v130_v23 = vpop.f32.mrf.mxu2  ;;  %v159_v24 = vpop.f32.mrf.mxu3  ;;  %245 = vmatpush.msrb.mxu2 %v105_v21 }
  0x8c   :  { %v131_v25 = vadd.f32 %v130_v23, %v75_v18  ;;  %v160_v26 = vadd.f32 %v159_v24, %v75_v18  ;;  %v188_v27 = vpop.f32.mrf.mxu0  ;;  %506 = vmatmul.msk.f32.vlgmr.msrb.gmra.mxu2 %vm226_vm2, %v194_v22  ;;  %v222_v37 = vpop.f32.mrf.mxu1 }
  0x8d   :  { %v189_v28 = vadd.f32 %v188_v27, %v75_v18  ;;  %510 = vmatpush.msk.msra.mxu2 %vm53_vm0, %v40_v2  ;;  %v223_v39 = vadd.f32 %v222_v37, %v200_v38 }
  0x8e   :  { %v133_v29 = vmax.f32 %v131_v25, 0.0  ;;  %v162_v30 = vmax.f32 %v160_v26, 0.0 }
  0x8f   :  { %v191_v31 = vmax.f32 %v189_v28, 0.0 }
  0x90   :  { %v456_v32 = vmax.f32 %v105_v21, %v133_v29  ;;  %268 = vmatpush.msrb.mxu3 %v133_v29  ;;  %291 = vmatpush.msra.mxu0 %v162_v30 }
  0x91   :  { %507 = vmatmul.msk.f32.vlgmr.msrb.gmra.mxu3 %vm226_vm2, %v194_v22  ;;  %508 = vmatmul.msk.f32.vlgmr.msra.gmra.mxu0 %vm226_vm2, %v194_v22 }
  0x92   :  { %v462_v33 = vmax.f32 %v456_v32, %v162_v30  ;;  %372 = vmatpush.msra.mxu3 %v105_v21  ;;  %395 = vmatpush.msrb.mxu0 %v133_v29 }
  0x93   :  { %314 = vmatpush.msra.mxu1 %v191_v31  ;;  %441 = vmatpush.msrb.mxu2 %v191_v31 }
  0x94   :  { %v468_v34 = vmax.f32 %v462_v33, %v191_v31  ;;  %509 = vmatmul.msk.f32.vlgmr.msra.gmra.mxu1 %vm226_vm2, %v194_v22  ;;  %511 = vmatmul.msk.f32.vlgmr.msra.gmra.mxu2 %vm49_vm1, %v322_v35 }
  0x95   :  { %418 = vmatpush.msrb.mxu1 %v162_v30 }
  0x96   :  { %471 = vst [vmem:[#allocation3 + $0x10] sm:$0xff] %v468_v34 }
 0x10e   :  { %v293_v40 = vpop.f32.mrf.mxu0 }
 0x10f   :  { %v294_v41 = vadd.f32 %v293_v40, %v223_v39  ;;  %v247_v42 = vpop.f32.mrf.mxu2 }
 0x110   :  { %v248_v43 = vadd.f32 %v247_v42, %v223_v39 }
 0x111   :  { %v296_v44 = vmax.f32 %v294_v41, 0.0  ;;  %v316_v45 = vpop.f32.mrf.mxu1 }
 0x112   :  { %v250_v46 = vmax.f32 %v248_v43, 0.0  ;;  %v317_v47 = vadd.f32 %v316_v45, %v223_v39 }
 0x113   :  { %419 = vmatpush.msrb.mxu1 %v296_v44 }
 0x114   :  { %v319_v49 = vmax.f32 %v317_v47, 0.0  ;;  %v270_v50 = vpop.f32.mrf.mxu3  ;;  %373 = vmatpush.msra.mxu3 %v250_v46  ;;  %514 = vmatmul.msk.f32.vlgmr.msrb.gmra.mxu1 %vm354_vm3, %v321_v48 }
 0x115   :  { %v271_v51 = vadd.f32 %v270_v50, %v223_v39  ;;  %512 = vmatmul.msk.f32.vlgmr.msra.gmra.mxu3 %vm354_vm3, %v321_v48 }
 0x116   :  { %442 = vmatpush.msrb.mxu2 %v319_v49 }
 0x117   :  { %v273_v52 = vmax.f32 %v271_v51, 0.0  ;;  %515 = vmatmul.msk.f32.vlgmr.msrb.gmra.mxu2 %vm354_vm3, %v321_v48  ;;  %v349_v56 = vpop.f32.mrf.mxu2 }
 0x118   :  { %v350_v58 = vadd.f32 %v349_v56, %v327_v57 }
 0x119   :  { %v455_v53 = vmax.f32 %v250_v46, %v273_v52  ;;  %396 = vmatpush.msrb.mxu0 %v273_v52 }
 0x11a   :  { %513 = vmatmul.msk.f32.vlgmr.msrb.gmra.mxu0 %vm354_vm3, %v321_v48 }
 0x11b   :  { %v461_v54 = vmax.f32 %v455_v53, %v296_v44 }
 0x11d   :  { %v467_v55 = vmax.f32 %v461_v54, %v319_v49 }
 0x11f   :  { %470 = vst [vmem:[#allocation3 + $0x8] sm:$0xff] %v467_v55 }
 0x191   :  { %v421_v61 = vpop.f32.mrf.mxu1 }
 0x192   :  { %v422_v2 = vadd.f32 %v421_v61, %v350_v58 }
 0x197   :  { %v398_v59 = vpop.f32.mrf.mxu0 }
 0x198   :  { %v375_v60 = vpop.f32.mrf.mxu3  ;;  %v399_v63 = vadd.f32 %v398_v59, %v350_v58 }
 0x199   :  { %v376_v62 = vadd.f32 %v375_v60, %v350_v58 }
 0x19a   :  { %v444_v0 = vpop.f32.mrf.mxu2 }
 0x19b   :  { %v454_v1 = vmax.f32 %v376_v62, %v399_v63  ;;  %v445_v4 = vadd.f32 %v444_v0, %v350_v58 }
 0x19d   :  { %v460_v3 = vmax.f32 %v454_v1, %v422_v2 }
 0x19f   :  { %v466_v5 = vmax.f32 %v460_v3, %v445_v4 }
 0x1a1   :  { %469 = vst [vmem:[#allocation3] sm:$0xff] %v466_v5 }
 0x1a2   :  { %485 = dma.vmem_to_hbm [thread:$0]  %s478_s10, 512, %s480_s19, [#allocation4], %s550_s20, %s550_s20, %s551_s21  }
 0x1a3   :  { %546 = dma.done.wait [#allocation4], 512  }
 0x1a4   :  { %547 = vsyncadd [#allocation4], 4294966784 }
 0x1a5   :  { %490 = vsyncpa [#allocation4], 1 }

</bundles_post_ra>
